<compile_context>
chip_gen: v7x
topology: tpu7x:2x2x1
jax: 0.10.0
libtpu: 0.0.40
codegen_flags: <defaults>
</compile_context>

<pallas_src>
import jax
import jax.numpy as jnp
from jax.experimental import pallas as pl
from jax.experimental.pallas import tpu as pltpu

LANE = 128   # lane width; final layer output padded to this for dense stores
CHUNK = 128  # in-kernel batch sub-tile (rows per pass through the layer chain)


def _round_up(n, m):
    return ((n + m - 1) // m) * m


def dqn_mlp_kernel(x_ref,
                   w1_ref, b1_ref,
                   w2_ref, b2_ref,
                   w3_ref, b3_ref,
                   w4_ref, b4_ref,
                   w5_ref, b5_ref,
                   out_ref):
    """One batch tile of the 5-layer MLP. Weights are VMEM-resident bf16."""
    tb, in_dim = x_ref.shape
    chunk = min(CHUNK, tb)          # wrapper guarantees tb % chunk == 0
    n_chunks = tb // chunk

    # Layer-1 weights are tiny (in_dim x 128); upcast once per grid step and
    # run layer 1 on the VPU as in_dim broadcast-FMAs (K=in_dim on the MXU
    # would pad to the full contraction depth — pure waste).
    w1 = w1_ref[...].astype(jnp.float32)        # (in_dim, 128)
    b1 = b1_ref[...]                             # (1, 128) f32

    def mxu_layer(h_bf16, w_ref, b_ref, relu):
        # bf16 operands into the MXU, f32 accumulation, f32 bias/ReLU on the
        # VPU (v5e has no bf16 VPU), then carry the activation as bf16 so the
        # per-chunk intermediates stay inside the vreg file.
        y = jnp.dot(h_bf16, w_ref[...],
                    preferred_element_type=jnp.float32) + b_ref[...]
        if relu:
            return jnp.maximum(y, 0.0).astype(jnp.bfloat16)
        return y

    # Static (fully unrolled) chunk loop: activations never round-trip to VMEM
    # between layers, and chunk i's MXU work overlaps chunk i-1's epilogue.
    for c in range(n_chunks):
        r = c * chunk
        x = x_ref[pl.ds(r, chunk), :]                 # (chunk, in_dim) f32
        # --- layer 1 on the VPU ---
        h = x[:, 0:1] * w1[0:1, :]
        for k in range(1, in_dim):
            h = h + x[:, k:k + 1] * w1[k:k + 1, :]
        h = jnp.maximum(h + b1, 0.0).astype(jnp.bfloat16)   # (chunk, 128)
        # --- layers 2..5 on the MXU ---
        h = mxu_layer(h, w2_ref, b2_ref, True)               # (chunk, 256)
        h = mxu_layer(h, w3_ref, b3_ref, True)               # (chunk, 128)
        h = mxu_layer(h, w4_ref, b4_ref, True)               # (chunk, 64)
        y = mxu_layer(h, w5_ref, b5_ref, False)               # (chunk, LANE) f32
        out_ref[pl.ds(r, chunk), :] = y.astype(out_ref.dtype)


def prepare_dqn_params(params_f32):
    """f32 (W:(in,out), b:(1,out)) params -> device layout: bf16 weights,
    f32 biases, final layer padded out to LANE lanes (lane-dense stores)."""
    device_params = []
    n_layers = len(params_f32)
    for i, (w, b) in enumerate(params_f32):
        if i == n_layers - 1 and w.shape[1] < LANE:
            pad = LANE - w.shape[1]
            w = jnp.pad(w, ((0, 0), (0, pad)))
            b = jnp.pad(b, ((0, 0), (0, pad)))
        device_params.append((w.astype(jnp.bfloat16), b.astype(jnp.float32)))
    return device_params


def dqn_forward(x, params_f32, *, block_b=1024):
    """x: (B, input_dim) f32. params_f32: list of (W:(in,out) f32, b:(1,out) f32)."""
    B, input_dim = x.shape
    num_actions = params_f32[-1][0].shape[1]
    device_params = prepare_dqn_params(params_f32)
    out_padded = device_params[-1][0].shape[1]

    # Batch tile: multiple of CHUNK for the in-kernel sub-tiling, capped so the
    # grid has >=2 steps whenever the batch allows it (v7x megacore), and
    # shrunk to a multiple of 8 sublanes for tiny batches.
    block_b = max(CHUNK, _round_up(block_b, CHUNK))
    if B > CHUNK:
        tb = min(block_b, max(CHUNK, _round_up(pl.cdiv(B, 2), CHUNK)))
    else:
        tb = _round_up(B, 8)
    padded_b = _round_up(B, tb)
    if padded_b != B:
        x = jnp.pad(x, ((0, padded_b - B), (0, 0)))
    grid = (padded_b // tb,)

    flat_args = [x]
    # NOTE: the (tb, 4) x block still occupies tb*128*4 bytes of VMEM per
    # buffer (lane padding); at tb=1024 that is ~0.5 MiB/buffer — accounted
    # for in the tile-size choice, well inside every generation's VMEM.
    in_specs = [pl.BlockSpec((tb, input_dim), lambda i: (i, 0))]
    for w, b in device_params:
        flat_args.extend([w, b])
        # Constant index_map -> weight/bias tiles stay VMEM-resident across
        # all batch tiles (Pallas skips re-DMA when the block index repeats).
        in_specs.append(pl.BlockSpec(w.shape, lambda i: (0, 0)))
        in_specs.append(pl.BlockSpec(b.shape, lambda i: (0, 0)))

    out_spec = pl.BlockSpec((tb, out_padded), lambda i: (i, 0))

    # Advisory cost estimate for XLA's scheduler.
    layer_dims = [(w.shape[0], w.shape[1]) for w, _ in device_params]
    flops = 2 * padded_b * sum(fi * fo for fi, fo in layer_dims)
    bytes_accessed = (
        x.size * x.dtype.itemsize
        + sum(w.size * w.dtype.itemsize + b.size * b.dtype.itemsize
              for w, b in device_params)
        + padded_b * out_padded * 2)            # bf16 output writeback
    cost = pl.CostEstimate(flops=flops, transcendentals=0,
                           bytes_accessed=bytes_accessed)

    out = pl.pallas_call(
        dqn_mlp_kernel,
        out_shape=jax.ShapeDtypeStruct((padded_b, out_padded), jnp.bfloat16),
        grid=grid,
        in_specs=in_specs,
        out_specs=out_spec,
        compiler_params=pltpu.CompilerParams(
            dimension_semantics=("parallel",),
            vmem_limit_bytes=32 * 1024 * 1024),   # explicit: v5e default is 16 MiB
        cost_estimate=cost,
    )(*flat_args)

    return out[:B, :num_actions].astype(jnp.float32)


def init_dqn_params(key, input_dim, num_actions):
    """Deterministic init mimicking PyTorch Linear default U(-1/sqrt(fan_in), +)."""
    sizes = [input_dim, 128, 256, 128, 64, num_actions]
    params = []
    for i in range(len(sizes) - 1):
        fan_in, fan_out = sizes[i], sizes[i + 1]
        key, kw, kb = jax.random.split(key, 3)
        bound = 1.0 / jnp.sqrt(jnp.float32(fan_in))
        w = jax.random.uniform(kw, (fan_in, fan_out), jnp.float32, -bound, bound)
        b = jax.random.uniform(kb, (1, fan_out), jnp.float32, -bound, bound)
        params.append((w, b))
    return params


def dqn_reference(x, params_f32):
    """Pure-JAX reference mirroring the kernel numerics: layer 1 is f32
    activations x bf16-rounded weights (VPU path); layers 2+ use bf16
    operands with f32 accumulation; output is bf16-rounded."""
    n = len(params_f32)
    w1, b1 = params_f32[0]
    h = x @ w1.astype(jnp.bfloat16).astype(jnp.float32) + b1
    h = jnp.maximum(h, 0.0)
    for i in range(1, n):
        w, b = params_f32[i]
        h = (h.astype(jnp.bfloat16).astype(jnp.float32)
             @ w.astype(jnp.bfloat16).astype(jnp.float32)) + b
        if i < n - 1:
            h = jnp.maximum(h, 0.0)
    return h.astype(jnp.bfloat16).astype(jnp.float32)


if __name__ == "__main__":
    key = jax.random.PRNGKey(0)
    key, kx = jax.random.split(key)

    batch = 8            # small demo batch; kernel tiles/streams larger batches
    input_dim = 4        # state dimension (e.g. CartPole)
    num_actions = 2

    x = jax.random.normal(kx, (batch, input_dim), dtype=jnp.float32)
    params = init_dqn_params(key, input_dim, num_actions)

    out = dqn_forward(x, params)
    out = jax.block_until_ready(out)

    ref = dqn_reference(x, params)
    assert out.shape == (batch, num_actions)
    assert jnp.allclose(out, ref, atol=2e-2, rtol=2e-2), "mismatch vs JAX reference"

    print("KERNEL_OK")
</pallas_src>

<mosaic_0001>
module attributes {stable_mosaic.version = 11 : i64} {
  func.func @dqn_mlp_kernel(%arg0: i32, %arg1: memref<8x4xf32, #tpu.memory_space<vmem>>, %arg2: memref<4x128xbf16, #tpu.memory_space<vmem>>, %arg3: memref<1x128xf32, #tpu.memory_space<vmem>>, %arg4: memref<128x256xbf16, #tpu.memory_space<vmem>>, %arg5: memref<1x256xf32, #tpu.memory_space<vmem>>, %arg6: memref<256x128xbf16, #tpu.memory_space<vmem>>, %arg7: memref<1x128xf32, #tpu.memory_space<vmem>>, %arg8: memref<128x64xbf16, #tpu.memory_space<vmem>>, %arg9: memref<1x64xf32, #tpu.memory_space<vmem>>, %arg10: memref<64x128xbf16, #tpu.memory_space<vmem>>, %arg11: memref<1x128xf32, #tpu.memory_space<vmem>>, %arg12: memref<8x128xbf16, #tpu.memory_space<vmem>>) attributes {dimension_semantics = [#tpu.dimension_semantics<parallel>], iteration_bounds = array<i64: 1>, scalar_prefetch = 0 : i64, scratch_operands = 0 : i64, tpu.core_type = #tpu.core_type<tc>, window_params = [{transform_indices = @transform_0, window_bounds = array<i64: 8, 4>}, {pipeline_mode = #tpu.pipeline_mode<synchronous>, transform_indices = @transform_1, window_bounds = array<i64: 4, 128>}, {pipeline_mode = #tpu.pipeline_mode<synchronous>, transform_indices = @transform_2, window_bounds = array<i64: 1, 128>}, {pipeline_mode = #tpu.pipeline_mode<synchronous>, transform_indices = @transform_3, window_bounds = array<i64: 128, 256>}, {pipeline_mode = #tpu.pipeline_mode<synchronous>, transform_indices = @transform_4, window_bounds = array<i64: 1, 256>}, {pipeline_mode = #tpu.pipeline_mode<synchronous>, transform_indices = @transform_5, window_bounds = array<i64: 256, 128>}, {pipeline_mode = #tpu.pipeline_mode<synchronous>, transform_indices = @transform_6, window_bounds = array<i64: 1, 128>}, {pipeline_mode = #tpu.pipeline_mode<synchronous>, transform_indices = @transform_7, window_bounds = array<i64: 128, 64>}, {pipeline_mode = #tpu.pipeline_mode<synchronous>, transform_indices = @transform_8, window_bounds = array<i64: 1, 64>}, {pipeline_mode = #tpu.pipeline_mode<synchronous>, transform_indices = @transform_9, window_bounds = array<i64: 64, 128>}, {pipeline_mode = #tpu.pipeline_mode<synchronous>, transform_indices = @transform_10, window_bounds = array<i64: 1, 128>}, {transform_indices = @transform_11, window_bounds = array<i64: 8, 128>}]} {
    %c0 = arith.constant 0 : index
    %c0_0 = arith.constant 0 : index
    %0 = vector.load %arg2[%c0, %c0_0] : memref<4x128xbf16, #tpu.memory_space<vmem>>, vector<4x128xbf16>
    %1 = arith.extf %0 : vector<4x128xbf16> to vector<4x128xf32>
    %c0_1 = arith.constant 0 : index
    %c0_2 = arith.constant 0 : index
    %2 = vector.load %arg3[%c0_1, %c0_2] : memref<1x128xf32, #tpu.memory_space<vmem>>, vector<1x128xf32>
    %c0_3 = arith.constant 0 : index
    %c0_4 = arith.constant 0 : index
    %3 = vector.load %arg1[%c0_3, %c0_4] : memref<8x4xf32, #tpu.memory_space<vmem>>, vector<8x4xf32>
    %4 = vector.extract_strided_slice %3 {offsets = [0, 0], sizes = [8, 1], strides = [1, 1]} : vector<8x4xf32> to vector<8x1xf32>
    %5 = vector.extract_strided_slice %1 {offsets = [0, 0], sizes = [1, 128], strides = [1, 1]} : vector<4x128xf32> to vector<1x128xf32>
    %6 = vector.broadcast %4 : vector<8x1xf32> to vector<8x128xf32>
    %7 = vector.broadcast %5 : vector<1x128xf32> to vector<8x128xf32>
    %8 = arith.mulf %6, %7 : vector<8x128xf32>
    %9 = vector.extract_strided_slice %3 {offsets = [0, 1], sizes = [8, 1], strides = [1, 1]} : vector<8x4xf32> to vector<8x1xf32>
    %10 = vector.extract_strided_slice %1 {offsets = [1, 0], sizes = [1, 128], strides = [1, 1]} : vector<4x128xf32> to vector<1x128xf32>
    %11 = vector.broadcast %9 : vector<8x1xf32> to vector<8x128xf32>
    %12 = vector.broadcast %10 : vector<1x128xf32> to vector<8x128xf32>
    %13 = arith.mulf %11, %12 : vector<8x128xf32>
    %14 = arith.addf %8, %13 : vector<8x128xf32>
    %15 = vector.extract_strided_slice %3 {offsets = [0, 2], sizes = [8, 1], strides = [1, 1]} : vector<8x4xf32> to vector<8x1xf32>
    %16 = vector.extract_strided_slice %1 {offsets = [2, 0], sizes = [1, 128], strides = [1, 1]} : vector<4x128xf32> to vector<1x128xf32>
    %17 = vector.broadcast %15 : vector<8x1xf32> to vector<8x128xf32>
    %18 = vector.broadcast %16 : vector<1x128xf32> to vector<8x128xf32>
    %19 = arith.mulf %17, %18 : vector<8x128xf32>
    %20 = arith.addf %14, %19 : vector<8x128xf32>
    %21 = vector.extract_strided_slice %3 {offsets = [0, 3], sizes = [8, 1], strides = [1, 1]} : vector<8x4xf32> to vector<8x1xf32>
    %22 = vector.extract_strided_slice %1 {offsets = [3, 0], sizes = [1, 128], strides = [1, 1]} : vector<4x128xf32> to vector<1x128xf32>
    %23 = vector.broadcast %21 : vector<8x1xf32> to vector<8x128xf32>
    %24 = vector.broadcast %22 : vector<1x128xf32> to vector<8x128xf32>
    %25 = arith.mulf %23, %24 : vector<8x128xf32>
    %26 = arith.addf %20, %25 : vector<8x128xf32>
    %27 = vector.broadcast %2 : vector<1x128xf32> to vector<8x128xf32>
    %28 = arith.addf %26, %27 : vector<8x128xf32>
    %cst = arith.constant 0.000000e+00 : f32
    %29 = vector.broadcast %cst : f32 to vector<8x128xf32>
    %30 = arith.maximumf %28, %29 : vector<8x128xf32>
    %31 = arith.truncf %30 : vector<8x128xf32> to vector<8x128xbf16>
    %c0_5 = arith.constant 0 : index
    %c0_6 = arith.constant 0 : index
    %32 = vector.load %arg4[%c0_5, %c0_6] : memref<128x256xbf16, #tpu.memory_space<vmem>>, vector<128x256xbf16>
    %cst_7 = arith.constant dense<0.000000e+00> : vector<8x256xf32>
    %33 = tpu.matmul %31, %32, %cst_7 {dimension_numbers = #tpu.dot_dimension_numbers<[1], [0], [0], [1], [0, 0, 1, 1], [], []>} : vector<8x128xbf16>, vector<128x256xbf16>, vector<8x256xf32> -> vector<8x256xf32>
    %c0_8 = arith.constant 0 : index
    %c0_9 = arith.constant 0 : index
    %34 = vector.load %arg5[%c0_8, %c0_9] : memref<1x256xf32, #tpu.memory_space<vmem>>, vector<1x256xf32>
    %35 = vector.broadcast %34 : vector<1x256xf32> to vector<8x256xf32>
    %36 = arith.addf %33, %35 : vector<8x256xf32>
    %cst_10 = arith.constant 0.000000e+00 : f32
    %37 = vector.broadcast %cst_10 : f32 to vector<8x256xf32>
    %38 = arith.maximumf %36, %37 : vector<8x256xf32>
    %39 = arith.truncf %38 : vector<8x256xf32> to vector<8x256xbf16>
    %c0_11 = arith.constant 0 : index
    %c0_12 = arith.constant 0 : index
    %40 = vector.load %arg6[%c0_11, %c0_12] : memref<256x128xbf16, #tpu.memory_space<vmem>>, vector<256x128xbf16>
    %cst_13 = arith.constant dense<0.000000e+00> : vector<8x128xf32>
    %41 = tpu.matmul %39, %40, %cst_13 {dimension_numbers = #tpu.dot_dimension_numbers<[1], [0], [0], [1], [0, 0, 1, 1], [], []>} : vector<8x256xbf16>, vector<256x128xbf16>, vector<8x128xf32> -> vector<8x128xf32>
    %c0_14 = arith.constant 0 : index
    %c0_15 = arith.constant 0 : index
    %42 = vector.load %arg7[%c0_14, %c0_15] : memref<1x128xf32, #tpu.memory_space<vmem>>, vector<1x128xf32>
    %43 = vector.broadcast %42 : vector<1x128xf32> to vector<8x128xf32>
    %44 = arith.addf %41, %43 : vector<8x128xf32>
    %cst_16 = arith.constant 0.000000e+00 : f32
    %45 = vector.broadcast %cst_16 : f32 to vector<8x128xf32>
    %46 = arith.maximumf %44, %45 : vector<8x128xf32>
    %47 = arith.truncf %46 : vector<8x128xf32> to vector<8x128xbf16>
    %c0_17 = arith.constant 0 : index
    %c0_18 = arith.constant 0 : index
    %48 = vector.load %arg8[%c0_17, %c0_18] : memref<128x64xbf16, #tpu.memory_space<vmem>>, vector<128x64xbf16>
    %cst_19 = arith.constant dense<0.000000e+00> : vector<8x64xf32>
    %49 = tpu.matmul %47, %48, %cst_19 {dimension_numbers = #tpu.dot_dimension_numbers<[1], [0], [0], [1], [0, 0, 1, 1], [], []>} : vector<8x128xbf16>, vector<128x64xbf16>, vector<8x64xf32> -> vector<8x64xf32>
    %c0_20 = arith.constant 0 : index
    %c0_21 = arith.constant 0 : index
    %50 = vector.load %arg9[%c0_20, %c0_21] : memref<1x64xf32, #tpu.memory_space<vmem>>, vector<1x64xf32>
    %51 = vector.broadcast %50 : vector<1x64xf32> to vector<8x64xf32>
    %52 = arith.addf %49, %51 : vector<8x64xf32>
    %cst_22 = arith.constant 0.000000e+00 : f32
    %53 = vector.broadcast %cst_22 : f32 to vector<8x64xf32>
    %54 = arith.maximumf %52, %53 : vector<8x64xf32>
    %55 = arith.truncf %54 : vector<8x64xf32> to vector<8x64xbf16>
    %c0_23 = arith.constant 0 : index
    %c0_24 = arith.constant 0 : index
    %56 = vector.load %arg10[%c0_23, %c0_24] : memref<64x128xbf16, #tpu.memory_space<vmem>>, vector<64x128xbf16>
    %cst_25 = arith.constant dense<0.000000e+00> : vector<8x128xf32>
    %57 = tpu.matmul %55, %56, %cst_25 {dimension_numbers = #tpu.dot_dimension_numbers<[1], [0], [0], [1], [0, 0, 1, 1], [], []>} : vector<8x64xbf16>, vector<64x128xbf16>, vector<8x128xf32> -> vector<8x128xf32>
    %c0_26 = arith.constant 0 : index
    %c0_27 = arith.constant 0 : index
    %58 = vector.load %arg11[%c0_26, %c0_27] : memref<1x128xf32, #tpu.memory_space<vmem>>, vector<1x128xf32>
    %59 = vector.broadcast %58 : vector<1x128xf32> to vector<8x128xf32>
    %60 = arith.addf %57, %59 : vector<8x128xf32>
    %61 = arith.truncf %60 : vector<8x128xf32> to vector<8x128xbf16>
    %c0_28 = arith.constant 0 : index
    %c0_29 = arith.constant 0 : index
    %62 = vector.load %arg12[%c0_28, %c0_29] : memref<8x128xbf16, #tpu.memory_space<vmem>>, vector<8x128xbf16>
    tpu.vector_store %arg12[%c0_28, %c0_29], %61 {strides = array<i32>} : memref<8x128xbf16, #tpu.memory_space<vmem>>, vector<8x128xbf16>,
    return
  }
  func.func @transform_0(%arg0: i32) -> (i32, i32) {
    %c0_i32 = arith.constant 0 : i32
    %c0_i32_0 = arith.constant 0 : i32
    return %arg0, %c0_i32 : i32, i32
  }
  func.func @transform_1(%arg0: i32) -> (i32, i32) {
    %c0_i32 = arith.constant 0 : i32
    %c0_i32_0 = arith.constant 0 : i32
    %c0_i32_1 = arith.constant 0 : i32
    return %c0_i32, %c0_i32_0 : i32, i32
  }
  func.func @transform_2(%arg0: i32) -> (i32, i32) {
    %c0_i32 = arith.constant 0 : i32
    %c0_i32_0 = arith.constant 0 : i32
    %c0_i32_1 = arith.constant 0 : i32
    return %c0_i32, %c0_i32_0 : i32, i32
  }
  func.func @transform_3(%arg0: i32) -> (i32, i32) {
    %c0_i32 = arith.constant 0 : i32
    %c0_i32_0 = arith.constant 0 : i32
    %c0_i32_1 = arith.constant 0 : i32
    return %c0_i32, %c0_i32_0 : i32, i32
  }
  func.func @transform_4(%arg0: i32) -> (i32, i32) {
    %c0_i32 = arith.constant 0 : i32
    %c0_i32_0 = arith.constant 0 : i32
    %c0_i32_1 = arith.constant 0 : i32
    return %c0_i32, %c0_i32_0 : i32, i32
  }
  func.func @transform_5(%arg0: i32) -> (i32, i32) {
    %c0_i32 = arith.constant 0 : i32
    %c0_i32_0 = arith.constant 0 : i32
    %c0_i32_1 = arith.constant 0 : i32
    return %c0_i32, %c0_i32_0 : i32, i32
  }
  func.func @transform_6(%arg0: i32) -> (i32, i32) {
    %c0_i32 = arith.constant 0 : i32
    %c0_i32_0 = arith.constant 0 : i32
    %c0_i32_1 = arith.constant 0 : i32
    return %c0_i32, %c0_i32_0 : i32, i32
  }
  func.func @transform_7(%arg0: i32) -> (i32, i32) {
    %c0_i32 = arith.constant 0 : i32
    %c0_i32_0 = arith.constant 0 : i32
    %c0_i32_1 = arith.constant 0 : i32
    return %c0_i32, %c0_i32_0 : i32, i32
  }
  func.func @transform_8(%arg0: i32) -> (i32, i32) {
    %c0_i32 = arith.constant 0 : i32
    %c0_i32_0 = arith.constant 0 : i32
    %c0_i32_1 = arith.constant 0 : i32
    return %c0_i32, %c0_i32_0 : i32, i32
  }
  func.func @transform_9(%arg0: i32) -> (i32, i32) {
    %c0_i32 = arith.constant 0 : i32
    %c0_i32_0 = arith.constant 0 : i32
    %c0_i32_1 = arith.constant 0 : i32
    return %c0_i32, %c0_i32_0 : i32, i32
  }
  func.func @transform_10(%arg0: i32) -> (i32, i32) {
    %c0_i32 = arith.constant 0 : i32
    %c0_i32_0 = arith.constant 0 : i32
    %c0_i32_1 = arith.constant 0 : i32
    return %c0_i32, %c0_i32_0 : i32, i32
  }
  func.func @transform_11(%arg0: i32) -> (i32, i32) {
    %c0_i32 = arith.constant 0 : i32
    %c0_i32_0 = arith.constant 0 : i32
    return %arg0, %c0_i32 : i32, i32
  }
}

</mosaic_0001>

<bundles_post_ra>
// kernel: tpu_custom_call.1
= control target key start
LH: loop header
LB: loop body
LE: loop exit
PB: predicated region body
PF: predicated region fallthrough
CT: control target
= control target key end

     0   :  { %16 = vsyncpa [#allocation3], 0  ;;  %s1090_s0 = inlined_call_operand.vmem [shape: f32[8,4], index: 0, kind: input, shape index: {}]   ;;  %s1091_s1 = inlined_call_operand.vmem [shape: bf16[4,128], index: 1, kind: input, shape index: {}]   ;;  %s1092_s2 = inlined_call_operand.vmem [shape: f32[1,128], index: 2, kind: input, shape index: {}]   ;;  %s1093_s3 = inlined_call_operand.hbm [shape: bf16[128,256], index: 3, kind: input, shape index: {}]   ;;  %s1094_s4 = inlined_call_operand.vmem [shape: f32[1,256], index: 4, kind: input, shape index: {}]   ;;  %s1095_s5 = inlined_call_operand.hbm [shape: bf16[256,128], index: 5, kind: input, shape index: {}]   ;;  %s1096_s6 = inlined_call_operand.vmem [shape: f32[1,128], index: 6, kind: input, shape index: {}]   ;;  %s1097_s7 = inlined_call_operand.vmem [shape: bf16[128,64], index: 7, kind: input, shape index: {}]   ;;  %s1098_s8 = inlined_call_operand.vmem [shape: f32[1,64], index: 8, kind: input, shape index: {}]   ;;  %s1099_s9 = inlined_call_operand.vmem [shape: bf16[64,128], index: 9, kind: input, shape index: {}]   ;;  %s1100_s10 = inlined_call_operand.vmem [shape: f32[1,128], index: 10, kind: input, shape index: {}]   ;;  %s1101_s11 = inlined_call_operand.hbm [shape: bf16[8,128], index: 11, kind: output, shape index: {}]  }
   0x1   :  { %17 = vsyncpa [#allocation6], 0 }
   0x2   :  { %18 = vsyncpa [#allocation4], 0  ;;  %s924_s17 = smov [#allocation2]   ;;  %s852_s21 = scalar_lea.hbm %s1093_s3, 2048 }
   0x3   :  { %s30_s18 = sshll.u32 %s924_s17, 4  ;;  %p853_p0 = scmp.ne.s32.totalorder %s1093_s3, %s852_s21  ;;  %s31_s18 = int_to_ptr.vmem [resolvable:$true] %s30_s18 }
   0x4   :  { %p856_p1 = scmp.lt.u32.totalorder %s852_s21, %s1093_s3 }
   0x6   :  { %p858_p2 = pnand %p856_p1, %p853_p0 }
   0x8   :  { %861 = shalt.err (!%p858_p2)
}
   0x9   :  { %s862_s26 = scalar_lea.vmem %s31_s18, 2048  ;;  %p867_p4 = scmp.lt.s32.totalorder %s31_s18, %s31_s18 }
   0xa   :  { %p863_p3 = scmp.ne.s32.totalorder %s31_s18, %s862_s26  ;;  %p868_p5 = scmp.lt.s32.totalorder %s862_s26, %s862_s26 }
   0xc   :  { %p869_p6 = por %p868_p5, %p867_p4 }
   0xe   :  { %p870_p7 = pnand %p869_p6, %p863_p3 }
  0x10   :  { %873 = shalt.err (!%p870_p7)
}
  0x11   :  { %s925_s27 = smov 128   ;;  %s926_s28 = smov 8  }
  0x12   :  { %36 = dma.hbm_to_vmem [thread:$0]  %s1093_s3, 2048, %s31_s18, [#allocation3], %s925_s27, %s925_s27, %s926_s28  }
  0x13   :  { %s927_s12 = smov [#allocation5]   ;;  %s874_s16 = scalar_lea.hbm %s1095_s5, 2048 }
  0x14   :  { %s44_s13 = sshll.u32 %s927_s12, 4  ;;  %p875_p8 = scmp.ne.s32.totalorder %s1095_s5, %s874_s16  ;;  %s45_s13 = int_to_ptr.vmem [resolvable:$true] %s44_s13 }
  0x15   :  { %p878_p9 = scmp.lt.u32.totalorder %s874_s16, %s1095_s5 }
  0x17   :  { %p880_p10 = pnand %p878_p9, %p875_p8 }
  0x19   :  { %883 = shalt.err (!%p880_p10)
}
  0x1a   :  { %s884_s22 = scalar_lea.vmem %s45_s13, 2048  ;;  %p889_p12 = scmp.lt.s32.totalorder %s45_s13, %s45_s13 }
  0x1b   :  { %p885_p11 = scmp.ne.s32.totalorder %s45_s13, %s884_s22  ;;  %p890_p13 = scmp.lt.s32.totalorder %s884_s22, %s884_s22 }
  0x1d   :  { %p891_p0 = por %p890_p13, %p889_p12 }
  0x1f   :  { %p892_p1 = pnand %p891_p0, %p885_p11 }
  0x21   :  { %895 = shalt.err (!%p892_p1)
}
  0x22   :  { %s928_s3 = smov 64   ;;  %s929_s18 = smov 4  }
  0x23   :  { %50 = dma.hbm_to_vmem [thread:$0]  %s1095_s5, 2048, %s45_s13, [#allocation6], %s928_s3, %s928_s3, %s929_s18  }
  0x24   :  { %918 = dma.done.wait [#allocation3], 2048  }
  0x25   :  { %919 = vsyncadd [#allocation3], 4294965248 }
  0x26   :  { %920 = dma.done.wait [#allocation6], 2048  }
  0x27   :  { %921 = vsyncadd [#allocation6], 4294965248  ;;  %v930_v0 = vmov 0   ;;  %v931_v1 = vmov 2   ;;  %v71_v2 = vld [vmem:[%s1090_s0] sm:$0xff]  ;;  %v932_v7 = vmov 1   ;;  %v77_v33 = vlaneseq }
  0x28   :  { %795 = vset.pattern.permute.xlu0 %v930_v0  ;;  %797 = vset.pattern.permute.xlu1 %v931_v1  ;;  %v800_v3 = vld [vmem:[#allocation2 + $0x4] ss:$8 sps:$4 sm:$0xff]   ;;  %v802_v4 = vld [vmem:[#allocation2] ss:$8 sps:$4 sm:$0xff]   ;;  %v803_v5 = vld [vmem:[#allocation2 + $0x14] ss:$8 sps:$4 sm:$0xff]  }
  0x29   :  { %261 = vmatprep.mubr.bf16.mxu0 %v930_v0  ;;  %74 = vperm.xlu0 %795, %v71_v2   ;;  %v805_v6 = vld [vmem:[#allocation2 + $0x10] ss:$8 sps:$4 sm:$0xff]   ;;  %v933_v8 = vmov 3   ;;  %v806_v9 = vld [vmem:[#allocation2 + $0x24] ss:$8 sps:$4 sm:$0xff]   ;;  %v78_v34 = vshrl.u32 %v77_v33, 7 }
  0x2a   :  { %93 = vperm.xlu1 %797, %v71_v2   ;;  %229 = vmatprep.subr.bf16.mxu0 %v800_v3  ;;  %v808_v10 = vld [vmem:[#allocation2 + $0x20] ss:$8 sps:$4 sm:$0xff]   ;;  %v809_v11 = vld [vmem:[#allocation2 + $0x34] ss:$8 sps:$4 sm:$0xff]   ;;  %v811_v12 = vld [vmem:[#allocation2 + $0x30] ss:$8 sps:$4 sm:$0xff]  }
  0x2b   :  { %230 = vmatpush1.bf16.msra.mxu0 %v802_v4  ;;  %v812_v13 = vld [vmem:[#allocation2 + $0x44] ss:$8 sps:$4 sm:$0xff]   ;;  %v814_v14 = vld [vmem:[#allocation2 + $0x40] ss:$8 sps:$4 sm:$0xff]   ;;  %v815_v15 = vld [vmem:[#allocation2 + $0x54] ss:$8 sps:$4 sm:$0xff]  }
  0x2c   :  { %231 = vmatprep.subr.bf16.mxu0 %v803_v5  ;;  %v817_v16 = vld [vmem:[#allocation2 + $0x50] ss:$8 sps:$4 sm:$0xff]   ;;  %v824_v17 = vld [vmem:[#allocation5 + $0x40] sm:$0xff]   ;;  %v826_v19 = vld [vmem:[#allocation5 + $0x48] sm:$0xff]   ;;  %v79_v36 = vsub.s32 0, %v78_v34  ;;  %v88_v38 = vsub.s32 1, %v78_v34 }
  0x2d   :  { %796 = vset.pattern.permute.xlu0 %v932_v7  ;;  %v825_v18 = vld [vmem:[#allocation5] sm:$0xff]   ;;  %714 = vmatprep.subr.bf16.mxu1 %v824_v17  ;;  %v821_v22 = vld [vmem:[#allocation2 + $0x74] ss:$8 sps:$4 sm:$0xff]   ;;  %v827_v23 = vld [vmem:[#allocation5 + $0x8] sm:$0xff]   ;;  %v98_v40 = vsub.s32 2, %v78_v34  ;;  %v108_v42 = vsub.s32 3, %v78_v34 }
  0x2e   :  { %798 = vset.pattern.permute.xlu1 %v933_v8  ;;  %83 = vperm.xlu0 %796, %v71_v2   ;;  %v818_v20 = vld [vmem:[#allocation2 + $0x64] ss:$8 sps:$4 sm:$0xff]   ;;  %v820_v21 = vld [vmem:[#allocation2 + $0x60] ss:$8 sps:$4 sm:$0xff]   ;;  %v828_v24 = vld [vmem:[#allocation5 + $0x50] sm:$0xff]   ;;  %v934_v1 = vmov 0.0  }
  0x2f   :  { %103 = vperm.xlu1 %798, %v71_v2   ;;  %232 = vmatpush1.bf16.msra.mxu0 %v805_v6  ;;  %v829_v25 = vld [vmem:[#allocation5 + $0x10] sm:$0xff]   ;;  %v830_v27 = vld [vmem:[#allocation5 + $0x58] sm:$0xff]   ;;  %v832_v29 = vld [vmem:[#allocation5 + $0x60] sm:$0xff]   ;;  %vm935_vm0 = vmmov 0   ;;  %vm603_vm1 = vcmask 523264  }
  0x30   :  { %233 = vmatprep.subr.bf16.mxu0 %v806_v9  ;;  %715 = vmatpush3.bf16.msra.mxu1 %v825_v18  ;;  %v823_v26 = vld [vmem:[#allocation2 + $0x70] ss:$8 sps:$4 sm:$0xff]   ;;  %v833_v30 = vld [vmem:[#allocation5 + $0x20] sm:$0xff]   ;;  %v834_v31 = vld [vmem:[#allocation5 + $0x68] sm:$0xff]  }
  0x31   :  { %716 = vmatprep.subr.bf16.mxu1 %v826_v19  ;;  %v831_v28 = vld [vmem:[#allocation5 + $0x18] sm:$0xff]   ;;  %v835_v32 = vld [vmem:[#allocation5 + $0x28] sm:$0xff]   ;;  %v68_v35 = vld [vmem:[%s1091_s1] sm:$0x3] }
  0x32   :  { %799 = vset.pattern.permute.xlu0 %v933_v8  ;;  %v69_v37 = vunpack.c.l.bf16 %v68_v35  ;;  %v665_v55 = vld [vmem:[%s1092_s2] ss:$0 sm:$0xff]  ;;  %v836_v60 = vld [vmem:[#allocation5 + $0x70] sm:$0xff]   ;;  %v838_v62 = vld [vmem:[#allocation5 + $0x78] sm:$0xff]  }
  0x33   :  { %234 = vmatpush1.bf16.msra.mxu0 %v808_v10  ;;  %v837_v61 = vld [vmem:[#allocation5 + $0x30] sm:$0xff]   ;;  %v839_v63 = vld [vmem:[#allocation5 + $0x38] sm:$0xff]   ;;  %v840_v0 = vld [vmem:[%s1097_s7] sm:$0xff]  }
  0x34   :  { %235 = vmatprep.subr.bf16.mxu0 %v809_v11  ;;  %717 = vmatpush3.bf16.msra.mxu1 %v827_v23  ;;  %v80_v43 = vrot.slane %v69_v37, %v79_v36  ;;  %v89_v44 = vrot.slane %v69_v37, %v88_v38  ;;  %v99_v45 = vrot.slane %v69_v37, %v98_v40  ;;  %v841_v2 = vld [vmem:[%s1097_s7 + $0x8] sm:$0xff]   ;;  %v842_v3 = vld [vmem:[%s1097_s7 + $0x10] sm:$0xff]   ;;  %v843_v4 = vld [vmem:[%s1097_s7 + $0x18] sm:$0xff]  }
  0x35   :  { %718 = vmatprep.subr.bf16.mxu1 %v828_v24  ;;  %v109_v46 = vrot.slane %v69_v37, %v108_v42  ;;  %v844_v5 = vld [vmem:[%s1097_s7 + $0x20] sm:$0xff]   ;;  %v845_v6 = vld [vmem:[%s1097_s7 + $0x28] sm:$0xff]   ;;  %v850_v33 = vld [vmem:[%s1099_s9 + $0x10] sm:$0xff]  }
  0x36   :  { %v137_v7 = vld [vmem:[%s1094_s4] sm:$0x3]  ;;  %v849_v23 = vld [vmem:[%s1099_s9 + $0x8] sm:$0xff]   ;;  %v851_v34 = vld [vmem:[%s1099_s9 + $0x18] sm:$0xff]  }
  0x37   :  { %236 = vmatpush1.bf16.msra.mxu0 %v811_v12  ;;  %v142_v8 = vrot.slane %v137_v7, %v79_v36  ;;  %v146_v9 = vrot.slane %v137_v7, %v88_v38  ;;  %v699_v35 = vld [vmem:[%s1098_s8] ss:$0 sm:$0xff] }
  0x38   :  { %237 = vmatprep.subr.bf16.mxu0 %v812_v13  ;;  %719 = vmatpush3.bf16.msra.mxu1 %v829_v25  ;;  %v682_v25 = vld [vmem:[%s1096_s6] ss:$0 sm:$0xff] }
  0x39   :  { %720 = vmatprep.subr.bf16.mxu1 %v830_v27 }
  0x3b   :  { %238 = vmatpush1.bf16.msra.mxu0 %v814_v14 }
  0x3c   :  { %239 = vmatprep.subr.bf16.mxu0 %v815_v15  ;;  %721 = vmatpush3.bf16.msra.mxu1 %v831_v28 }
  0x3d   :  { %722 = vmatprep.subr.bf16.mxu1 %v832_v29 }
  0x3f   :  { %240 = vmatpush1.bf16.msra.mxu0 %v817_v16 }
  0x40   :  { %241 = vmatprep.subr.bf16.mxu0 %v818_v20  ;;  %723 = vmatpush3.bf16.msra.mxu1 %v833_v30  ;;  %v846_v20 = vld [vmem:[%s1097_s7 + $0x30] sm:$0xff]  }
  0x41   :  { %724 = vmatprep.subr.bf16.mxu1 %v834_v31 }
  0x43   :  { %242 = vmatpush1.bf16.msra.mxu0 %v820_v21  ;;  %v847_v21 = vld [vmem:[%s1097_s7 + $0x38] sm:$0xff]  }
  0x44   :  { %243 = vmatprep.subr.bf16.mxu0 %v821_v22  ;;  %725 = vmatpush3.bf16.msra.mxu1 %v835_v32  ;;  %v848_v22 = vld [vmem:[%s1099_s9] sm:$0xff]   ;;  %s936_s9 = smov [#allocation7]  }
  0x45   :  { %726 = vmatprep.subr.bf16.mxu1 %v836_v60  ;;  %s655_s13 = sshll.u32 %s936_s9, 4  ;;  %s656_s13 = int_to_ptr.vmem [resolvable:$true] %s655_s13 }
  0x46   :  { %s896_s8 = scalar_lea.vmem %s656_s13, 64  ;;  %p901_p3 = scmp.lt.s32.totalorder %s656_s13, %s656_s13 }
  0x47   :  { %244 = vmatpush1.bf16.msra.mxu0 %v823_v26  ;;  %p897_p2 = scmp.ne.s32.totalorder %s656_s13, %s896_s8  ;;  %p902_p4 = scmp.lt.s32.totalorder %s896_s8, %s896_s8 }
  0x48   :  { %727 = vmatpush3.bf16.msra.mxu1 %v837_v61  ;;  %750 = vmatprep.subr.bf16.mxu0 %v934_v1 }
  0x49   :  { %728 = vmatprep.subr.bf16.mxu1 %v838_v62  ;;  %p903_p5 = por %p902_p4, %p901_p3 }
  0x4b   :  { %p904_p6 = pnand %p903_p5, %p897_p2 }
  0x4c   :  { %729 = vmatpush3.bf16.msra.mxu1 %v839_v63 }
  0x4d   :  { %770 = vmatprep.subr.bf16.mxu1 %v934_v1 }
  0xa8   :  { %v75_v39 = vpop.permute.xlu0 %74 }
  0xa9   :  { %v94_v41 = vpop.permute.xlu1 %93  ;;  %v81_v49 = vmul.f32 %v80_v43, %v75_v39  ;;  %v708_v43 = vld [vmem:[%s1100_s10] ss:$0 sm:$0xff] }
  0xaa   :  { %v100_v51 = vmul.f32 %v99_v45, %v94_v41 }
  0xad   :  { %v84_v47 = vpop.permute.xlu0 %83 }
  0xae   :  { %v104_v48 = vpop.permute.xlu1 %103  ;;  %v90_v50 = vmul.f32 %v89_v44, %v84_v47 }
  0xaf   :  { %v110_v53 = vmul.f32 %v109_v46, %v104_v48 }
  0xb0   :  { %v91_v52 = vadd.f32 %v90_v50, %v81_v49 }
  0xb2   :  { %v101_v54 = vadd.f32 %v100_v51, %v91_v52 }
  0xb4   :  { %v111_v56 = vadd.f32 %v110_v53, %v101_v54 }
  0xb6   :  { %v118_v57 = vadd.f32 %v665_v55, %v111_v56 }
  0xb8   :  { %v119_v58 = vmax.f32 %v118_v57, 0.0 }
  0xba   :  { %v120_v59 = vpack.c.bf16 %v119_v58, %v119_v58 }
  0xbc   :  { %262 = vmatmul.mubr.bf16.vlgmr.msra.gmra.mrb[0].mxu0 %v120_v59 }
  0xbd   :  { %751 = vmatpush3.bf16.msra.mxu0 %v840_v0  ;;  %766 = vmatprep.mubr.msk.bf16.mxu0 %vm935_vm0, %v934_v1 }
  0xbe   :  { %752 = vmatprep.subr.bf16.mxu0 %v934_v1 }
  0xc1   :  { %753 = vmatpush3.bf16.msra.mxu0 %v841_v2 }
  0xc2   :  { %754 = vmatprep.subr.bf16.mxu0 %v934_v1 }
  0xc5   :  { %755 = vmatpush3.bf16.msra.mxu0 %v842_v3 }
  0xc6   :  { %756 = vmatprep.subr.bf16.mxu0 %v934_v1 }
  0xc9   :  { %757 = vmatpush3.bf16.msra.mxu0 %v843_v4 }
  0xca   :  { %758 = vmatprep.subr.bf16.mxu0 %v934_v1 }
  0xcd   :  { %759 = vmatpush3.bf16.msra.mxu0 %v844_v5 }
  0xce   :  { %760 = vmatprep.subr.bf16.mxu0 %v934_v1 }
  0xd1   :  { %761 = vmatpush3.bf16.msra.mxu0 %v845_v6 }
  0xd2   :  { %762 = vmatprep.subr.bf16.mxu0 %v934_v1 }
  0xd5   :  { %763 = vmatpush3.bf16.msra.mxu0 %v846_v20 }
  0xd6   :  { %764 = vmatprep.subr.bf16.mxu0 %v934_v1 }
  0xd9   :  { %765 = vmatpush3.bf16.msra.mxu0 %v847_v21 }
 0x18f   :  { %v263_v10 = vpop.f32.mrb[0].mxu0 }
 0x190   :  { %v264_v11 = vadd.f32 %v263_v10, %v142_v8  ;;  %v265_v12 = vpop.f32.mrb[1].mxu0 }
 0x191   :  { %v266_v13 = vadd.f32 %v265_v12, %v146_v9  ;;  %v267_v14 = vpop.f32.mrb[2].mxu0 }
 0x192   :  { %v270_v15 = vmax.f32 %v264_v11, 0.0  ;;  %v268_v16 = vpop.f32.mrb[3].mxu0 }
 0x193   :  { %v271_v17 = vmax.f32 %v266_v13, 0.0 }
 0x194   :  { %v272_v19 = vpack.c.bf16 %v270_v15, %v270_v15 }
 0x195   :  { %v273_v18 = vpack.c.bf16 %v271_v17, %v271_v17 }
 0x197   :  { %441 = vmatprep.mubr.bf16.mxu1 %v273_v18 }
 0x198   :  { %442 = vmatmul.mubr.bf16.vlgmr.msra.gmra.mrb[0].mxu1 %v272_v19 }
 0x199   :  { %778 = vmatprep.mubr.msk.bf16.mxu1 %vm935_vm0, %v934_v1  ;;  %771 = vmatpush3.bf16.msra.mxu1 %v848_v22 }
 0x19a   :  { %772 = vmatprep.subr.bf16.mxu1 %v934_v1 }
 0x19d   :  { %773 = vmatpush3.bf16.msra.mxu1 %v849_v23 }
 0x19e   :  { %774 = vmatprep.subr.bf16.mxu1 %v934_v1 }
 0x1a1   :  { %775 = vmatpush3.bf16.msra.mxu1 %v850_v33 }
 0x1a2   :  { %776 = vmatprep.subr.bf16.mxu1 %v934_v1 }
 0x1a5   :  { %777 = vmatpush3.bf16.msra.mxu1 %v851_v34 }
 0x26b   :  { %v730_v24 = vpop.f32.mrb[0].mxu1 }
 0x26c   :  { %v731_v26 = vpop.f32.mrb[1].mxu1 }
 0x26d   :  { %v732_v27 = vadd.f32 %v731_v26, %v730_v24  ;;  %v733_v28 = vpop.f32.mrb[2].mxu1 }
 0x26e   :  { %v734_v29 = vpop.f32.mrb[3].mxu1 }
 0x26f   :  { %v444_v30 = vadd.f32 %v732_v27, %v682_v25 }
 0x271   :  { %v449_v31 = vmax.f32 %v444_v30, 0.0 }
 0x273   :  { %v450_v32 = vpack.c.bf16 %v449_v31, %v449_v31 }
 0x275   :  { %767 = vmatmul.mubr.bf16.vlgmr.msra.gmra.mrb[4].mxu0 %v450_v32 }
 0x348   :  { %v556_v36 = vpop.f32.mrb[4].mxu0 }
 0x349   :  { %v557_v37 = vadd.f32 %v699_v35, %v556_v36  ;;  %v768_v38 = vpop.f32.mrb[5].mxu0 }
 0x34a   :  { %v559_v39 = vpop.f32.mrb[6].mxu0 }
 0x34b   :  { %v562_v40 = vmax.f32 %v557_v37, 0.0  ;;  %v769_v41 = vpop.f32.mrb[7].mxu0 }
 0x34d   :  { %v563_v42 = vpack.c.bf16 %v562_v40, %v562_v40 }
 0x34f   :  { %779 = vmatmul.mubr.msk.bf16.vlgmr.msra.gmra.mrb[4].mxu1 %vm603_vm1, %v563_v42 }
 0x422   :  { %v641_v44 = vpop.f32.mrb[4].mxu1 }
 0x423   :  { %v642_v45 = vadd.f32 %v708_v43, %v641_v44  ;;  %v780_v46 = vpop.f32.mrb[5].mxu1 }
 0x424   :  { %v644_v47 = vpop.f32.mrb[6].mxu1 }
 0x425   :  { %v647_v48 = vpack.c.bf16 %v642_v45, %v642_v45  ;;  %v781_v49 = vpop.f32.mrb[7].mxu1 }
 0x427   :  { %648 = vst [vmem:[#allocation7] sm:$0xf] %v647_v48 }
 0x428   :  { %907 = shalt.err (!%p904_p6)
}
 0x429   :  { %s908_s10 = scalar_lea.hbm %s1101_s11, 64 }
 0x42a   :  { %p909_p7 = scmp.ne.s32.totalorder %s1101_s11, %s908_s10  ;;  %p912_p8 = scmp.lt.u32.totalorder %s908_s10, %s1101_s11 }
 0x42c   :  { %p914_p9 = pnand %p912_p8, %p909_p7 }
 0x42e   :  { %917 = shalt.err (!%p914_p9)
}
 0x42f   :  { %658 = dma.vmem_to_hbm [thread:$0]  %s656_s13, 64, %s1101_s11, [#allocation4]  }
 0x430   :  { %922 = dma.done.wait [#allocation4], 64  }
 0x431   :  { %923 = vsyncadd [#allocation4], 4294967232 }
 0x432   :  { %662 = vsyncpa [#allocation3], 1 }
 0x433   :  { %663 = vsyncpa [#allocation6], 1 }
 0x434   :  { %664 = vsyncpa [#allocation4], 1 }

</bundles_post_ra>
